<compile_context>
chip_gen: v6e
topology: v6e:2x2x1
jax: 0.10.0
libtpu: 0.0.40
codegen_flags: <defaults>
</compile_context>

<pallas_src>
import math
from functools import partial

import jax
import jax.numpy as jnp
import numpy as np
from jax.experimental import pallas as pl
from jax.experimental.pallas import tpu as pltpu


# ----------------------------- in-kernel helpers -----------------------------

def _layernorm(v, g, b, eps=1e-5):
    mu = jnp.mean(v, axis=-1, keepdims=True)
    var = jnp.mean((v - mu) ** 2, axis=-1, keepdims=True)
    return (v - mu) * jax.lax.rsqrt(var + eps) * g + b


def _gelu_exact(v):
    # torch.nn.GELU() default = exact (erf) formulation
    return 0.5 * v * (1.0 + jax.lax.erf(v * (1.0 / math.sqrt(2.0))))


def _softmax_rows(logits):
    """Numerically-stable softmax along the last axis.

    The exact divide only touches the (rows, 1) denominator vector, so it is
    negligible next to the broadcast multiply and keeps sum(probs) == 1 to f32
    rounding (the approx EUP reciprocal did not)."""
    logits = logits - jnp.max(logits, axis=-1, keepdims=True)
    e = jnp.exp(logits)
    inv = 1.0 / jnp.sum(e, axis=-1, keepdims=True)
    return e * inv


def _nbytes(a):
    return int(np.prod(a.shape)) * a.dtype.itemsize


def _clamp_vmem(nbytes):
    # ~30% headroom on the computed working set, clamped so it never asks for
    # more than v7x's 64 MiB physical VMEM (v5e/v6e have 128 MiB).
    return int(min(max(int(nbytes * 1.3) + (4 << 20), 32 << 20), 64 << 20))


# ------------------------- meta_branch (vit_branch) --------------------------
# One pre-norm transformer block (grad_from_block keeps only the top block(s))
# followed by the backbone's final LayerNorm, return_all_patches=True.

def _vit_block_kernel(x_ref,
                      ln1_g, ln1_b, qkv_w, qkv_b, proj_w, proj_b,
                      ln2_g, ln2_b, fc1_w, fc1_b, fc2_w, fc2_b,
                      nf_g, nf_b,
                      o_ref, *, num_heads):
    x = x_ref[0].astype(jnp.float32)                       # (N, D)
    n, d = x.shape
    dh = d // num_heads
    scale = 1.0 / math.sqrt(dh)
    nt_dims = (((1,), (1,)), ((), ()))                     # A @ B^T, no transpose op

    # --- attention ---
    h = _layernorm(x, ln1_g[...], ln1_b[...])
    qkv = jnp.dot(h.astype(jnp.bfloat16), qkv_w[...],
                  preferred_element_type=jnp.float32) + qkv_b[...]   # (N, 3D) f32
    q = qkv[:, :d] * scale
    k = qkv[:, d:2 * d]
    v = qkv[:, 2 * d:]

    # Per-head attention, accumulated straight into the output projection:
    # no lane-axis concatenate, no explicit kh.T (NT matmul via dot_general),
    # single f32 accumulator (static unrolled loop).
    attn = jnp.zeros((n, d), jnp.float32)
    for hd in range(num_heads):
        s0, s1 = hd * dh, (hd + 1) * dh
        qh = q[:, s0:s1].astype(jnp.bfloat16)
        kh = k[:, s0:s1].astype(jnp.bfloat16)
        vh = v[:, s0:s1].astype(jnp.bfloat16)
        s = jax.lax.dot_general(qh, kh, nt_dims,
                                preferred_element_type=jnp.float32)  # (N, N)
        p = _softmax_rows(s)
        hv = jnp.dot(p.astype(jnp.bfloat16), vh,
                     preferred_element_type=jnp.float32)             # (N, dh)
        attn = attn + jnp.dot(hv.astype(jnp.bfloat16), proj_w[s0:s1, :],
                              preferred_element_type=jnp.float32)    # (N, D)
    x = x + attn + proj_b[...]

    # --- MLP ---
    h2 = _layernorm(x, ln2_g[...], ln2_b[...])
    h2 = jnp.dot(h2.astype(jnp.bfloat16), fc1_w[...],
                 preferred_element_type=jnp.float32) + fc1_b[...]
    h2 = _gelu_exact(h2)
    h2 = jnp.dot(h2.astype(jnp.bfloat16), fc2_w[...],
                 preferred_element_type=jnp.float32) + fc2_b[...]
    x = x + h2

    # --- backbone final norm (return_all_patches=True: keep all tokens) ---
    x = _layernorm(x, nf_g[...], nf_b[...])
    o_ref[0] = x.astype(o_ref.dtype)


def vit_branch_forward(x, p, *, num_heads):
    B, N, D = x.shape
    w_names = ("ln1_g", "ln1_b", "qkv_w", "qkv_b", "proj_w", "proj_b",
               "ln2_g", "ln2_b", "fc1_w", "fc1_b", "fc2_w", "fc2_b",
               "nf_g", "nf_b")
    weights = [p[n] for n in w_names]
    # Constant-index weights: keep a single resident VMEM copy instead of a
    # per-grid-step double-buffered blocked operand.
    w_specs = [pl.BlockSpec(memory_space=pltpu.MemorySpace.VMEM)] * len(weights)

    H = p["fc1_w"].shape[1]
    w_bytes = sum(_nbytes(w) for w in weights)
    blk_bytes = N * D * 4
    act_bytes = N * (3 * D + H + 4 * D) * 4               # qkv + mlp hidden + temps
    vmem = _clamp_vmem(w_bytes + 4 * blk_bytes + act_bytes)

    return pl.pallas_call(
        partial(_vit_block_kernel, num_heads=num_heads),
        out_shape=jax.ShapeDtypeStruct((B, N, D), jnp.float32),
        grid=(B,),
        in_specs=[pl.BlockSpec((1, N, D), lambda b: (b, 0, 0))] + w_specs,
        out_specs=pl.BlockSpec((1, N, D), lambda b: (b, 0, 0)),
        compiler_params=pltpu.CompilerParams(
            dimension_semantics=("parallel",),
            vmem_limit_bytes=vmem),
    )(x, *weights)


# ----------------- fused attribute_subnet + classifier heads -----------------
# One pallas_call, grid over attribute heads.  meta's block index is constant
# across the grid (stays resident); each head's weights are a blocked operand
# that pipelines under the previous head's compute.

def _attr_heads_kernel(m_ref, conv_w, conv_b, bn_g, bn_b, ln_g, ln_b,
                       lin_w, lin_b, o_ref):
    m = m_ref[...].astype(jnp.float32)                     # (B, N, D)
    B, N, D = m.shape
    flat = m.reshape(B * N, D)

    # Conv1d(kernel=1) over channels == per-token linear (bf16 ops, f32 acc).
    h = jnp.dot(flat.astype(jnp.bfloat16), conv_w[0],
                preferred_element_type=jnp.float32) + conv_b[0]

    # BatchNorm1d: training-mode batch statistics over (B, N) per channel
    # (biased variance), matching a freshly-constructed torch module.
    # TODO(synk): at production B*N this should be tiled over N with two-pass
    # (sum/sumsq) statistics so the activation block fits v7x's 64 MiB VMEM.
    mu = jnp.mean(h, axis=0, keepdims=True)
    var = jnp.mean((h - mu) ** 2, axis=0, keepdims=True)
    h = (h - mu) * jax.lax.rsqrt(var + 1e-5) * bn_g[0] + bn_b[0]

    h = _gelu_exact(h)

    # AdaptiveMaxPool1d(1) over tokens + Flatten -> (B, D), then LayerNorm.
    pooled = jnp.max(h.reshape(B, N, D), axis=1)
    pooled = _layernorm(pooled, ln_g[0], ln_b[0])

    # Linear classifier into a lane-dense (B, Kp=128) slab + Softmax(dim=1).
    # Padded columns carry a -1e30 bias -> exactly zero probability.
    logits = jnp.dot(pooled.astype(jnp.bfloat16), lin_w[0],
                     preferred_element_type=jnp.float32) + lin_b[0]
    o_ref[0] = _softmax_rows(logits).astype(o_ref.dtype)


def attribute_heads_forward(meta, stacked, k_list):
    B, N, D = meta.shape
    A, _, Kp = stacked["lin_w"].shape
    w_names = ("conv_w", "conv_b", "bn_g", "bn_b", "ln_g", "ln_b",
               "lin_w", "lin_b")
    weights = [stacked[n] for n in w_names]
    w_specs = [pl.BlockSpec((1,) + w.shape[1:], lambda a: (a, 0, 0))
               for w in weights]

    per_head_w_bytes = sum(_nbytes(w) // A for w in weights)
    vmem = _clamp_vmem(_nbytes(meta) + 2 * per_head_w_bytes + 4 * B * N * D * 4)

    out = pl.pallas_call(
        _attr_heads_kernel,
        out_shape=jax.ShapeDtypeStruct((A, B, Kp), jnp.float32),
        grid=(A,),
        in_specs=[pl.BlockSpec((B, N, D), lambda a: (0, 0, 0))] + w_specs,
        out_specs=pl.BlockSpec((1, B, Kp), lambda a: (a, 0, 0)),
        compiler_params=pltpu.CompilerParams(
            dimension_semantics=("parallel",),
            vmem_limit_bytes=vmem),
    )(meta, *weights)
    return [out[i, :, :k] for i, k in enumerate(k_list)]


# ------------------------------ full forward ---------------------------------

def meta_attribute_generator_forward(x, vit_params, stacked_heads, k_list,
                                     *, num_heads):
    meta = vit_branch_forward(x, vit_params, num_heads=num_heads)
    # torch: meta_embedding = transpose(meta, 1, 2) -> absorbed into head kernel
    return attribute_heads_forward(meta, stacked_heads, k_list)


# ------------------------------ pure-JAX reference ---------------------------

def _ref_forward(x, p, head_ps, num_heads):
    def ln(v, g, b):
        mu = v.mean(-1, keepdims=True)
        var = ((v - mu) ** 2).mean(-1, keepdims=True)
        return (v - mu) / jnp.sqrt(var + 1e-5) * g + b

    def gelu(v):
        return 0.5 * v * (1.0 + jax.lax.erf(v / math.sqrt(2.0)))

    B, N, D = x.shape
    dh = D // num_heads
    h = ln(x, p["ln1_g"], p["ln1_b"])
    qkv = h @ p["qkv_w"].astype(jnp.float32) + p["qkv_b"]
    q, k, v = qkv[..., :D], qkv[..., D:2 * D], qkv[..., 2 * D:]
    q = q.reshape(B, N, num_heads, dh).transpose(0, 2, 1, 3)
    k = k.reshape(B, N, num_heads, dh).transpose(0, 2, 1, 3)
    v = v.reshape(B, N, num_heads, dh).transpose(0, 2, 1, 3)
    s = jnp.einsum("bhnd,bhmd->bhnm", q, k) / math.sqrt(dh)
    a = jax.nn.softmax(s, axis=-1)
    o = jnp.einsum("bhnm,bhmd->bhnd", a, v).transpose(0, 2, 1, 3).reshape(B, N, D)
    x1 = x + (o @ p["proj_w"].astype(jnp.float32) + p["proj_b"])
    h2 = ln(x1, p["ln2_g"], p["ln2_b"])
    h2 = (gelu(h2 @ p["fc1_w"].astype(jnp.float32) + p["fc1_b"])
          @ p["fc2_w"].astype(jnp.float32) + p["fc2_b"])
    meta = ln(x1 + h2, p["nf_g"], p["nf_b"])

    outs = []
    for hp in head_ps:
        flat = meta.reshape(B * N, D)
        t = flat @ hp["conv_w"].astype(jnp.float32) + hp["conv_b"]
        mu = t.mean(0, keepdims=True)
        var = ((t - mu) ** 2).mean(0, keepdims=True)
        t = (t - mu) / jnp.sqrt(var + 1e-5) * hp["bn_g"] + hp["bn_b"]
        t = gelu(t)
        pooled = t.reshape(B, N, D).max(axis=1)
        pooled = ln(pooled, hp["ln_g"], hp["ln_b"])
        logits = pooled @ hp["lin_w"].astype(jnp.float32) + hp["lin_b"]
        outs.append(jax.nn.softmax(logits, axis=1))
    return outs


# ------------------------------ parameter init -------------------------------

def _trunc_normal(key, shape, std=0.02):
    return (std * jax.random.truncated_normal(key, -2.0, 2.0, shape)).astype(jnp.float32)


def init_params(key, D, mlp_ratio, dict_attribute):
    ks = iter(jax.random.split(key, 64))
    H = mlp_ratio * D
    ones = lambda s: jnp.ones(s, jnp.float32)
    zeros = lambda s: jnp.zeros(s, jnp.float32)
    bf16 = lambda a: a.astype(jnp.bfloat16)   # matmul weights stored bf16
    # nn.Linear weights get trunc_normal(std=0.02), biases 0 (self._init_weights)
    vit = dict(
        ln1_g=ones((1, D)), ln1_b=zeros((1, D)),
        qkv_w=bf16(_trunc_normal(next(ks), (D, 3 * D))), qkv_b=zeros((1, 3 * D)),
        proj_w=bf16(_trunc_normal(next(ks), (D, D))), proj_b=zeros((1, D)),
        ln2_g=ones((1, D)), ln2_b=zeros((1, D)),
        fc1_w=bf16(_trunc_normal(next(ks), (D, H))), fc1_b=zeros((1, H)),
        fc2_w=bf16(_trunc_normal(next(ks), (H, D))), fc2_b=zeros((1, D)),
        nf_g=ones((1, D)), nf_b=zeros((1, D)),
    )
    heads = []
    for _, values in dict_attribute.items():
        K = len(values) + 1
        heads.append(dict(
            conv_w=bf16(_trunc_normal(next(ks), (D, D), std=0.05)),
            conv_b=_trunc_normal(next(ks), (1, D), std=0.05),
            bn_g=ones((1, D)), bn_b=zeros((1, D)),
            ln_g=ones((1, D)), ln_b=zeros((1, D)),
            lin_w=bf16(_trunc_normal(next(ks), (D, K))),
            lin_b=zeros((1, K)),
        ))
    return vit, heads


def stack_head_params(heads, k_pad):
    """Stack per-head weights along a leading head axis; pad classifiers to a
    lane-dense width (padding weight cols = 0, padding bias = -1e30)."""
    def pad_last(a, width, fill):
        return jnp.pad(a, [(0, 0)] * (a.ndim - 1) + [(0, width - a.shape[-1])],
                       constant_values=fill)
    stacked = {n: jnp.stack([hp[n] for hp in heads])
               for n in ("conv_w", "conv_b", "bn_g", "bn_b", "ln_g", "ln_b")}
    stacked["lin_w"] = jnp.stack([pad_last(hp["lin_w"], k_pad, 0.0) for hp in heads])
    stacked["lin_b"] = jnp.stack([pad_last(hp["lin_b"], k_pad, -1e30) for hp in heads])
    return stacked


# ----------------------------------- main -------------------------------------

if __name__ == "__main__":
    # NOTE: toy sizes for the self-test; at D=32 every matmul is MXU-padding
    # dominated — the structural optimizations matter at ViT scale (D>=384).
    B, N, D, NUM_HEADS, MLP_RATIO = 2, 8, 32, 4, 4
    dict_attribute = {"color": ["red", "blue", "green"], "material": ["metal", "wood"]}
    k_list = [len(v) + 1 for v in dict_attribute.values()]
    KP = max(128, ((max(k_list) + 127) // 128) * 128)      # lane-dense logits slab

    root = jax.random.PRNGKey(0)
    k_x, k_p = jax.random.split(root)
    x = jax.random.normal(k_x, (B, N, D), dtype=jnp.float32)
    vit_params, head_list = init_params(k_p, D, MLP_RATIO, dict_attribute)
    stacked_heads = stack_head_params(head_list, KP)

    outs = meta_attribute_generator_forward(x, vit_params, stacked_heads, k_list,
                                            num_heads=NUM_HEADS)
    outs = [jax.block_until_ready(o) for o in outs]

    # sanity check against a plain-JAX (f32 math) reference; tolerance reflects
    # bf16 matmul operands in the kernels.  Softmax normalization is exact, so
    # probabilities must sum to 1 within f32 rounding.
    refs = _ref_forward(x, vit_params, head_list, NUM_HEADS)
    for o, r, k in zip(outs, refs, k_list):
        assert o.shape == (B, k), o.shape
        np.testing.assert_allclose(np.asarray(o), np.asarray(r),
                                   rtol=2e-2, atol=2e-3)
        np.testing.assert_allclose(np.asarray(o).sum(axis=1), 1.0, atol=1e-3)

    print("KERNEL_OK")
</pallas_src>

<mosaic_0001>
module attributes {stable_mosaic.version = 11 : i64} {
  func.func @_vit_block_kernel(%arg0: i32, %arg1: memref<1x8x32xf32, #tpu.memory_space<vmem>>, %arg2: memref<1x32xf32, #tpu.memory_space<vmem>>, %arg3: memref<1x32xf32, #tpu.memory_space<vmem>>, %arg4: memref<32x96xbf16, #tpu.memory_space<vmem>>, %arg5: memref<1x96xf32, #tpu.memory_space<vmem>>, %arg6: memref<32x32xbf16, #tpu.memory_space<vmem>>, %arg7: memref<1x32xf32, #tpu.memory_space<vmem>>, %arg8: memref<1x32xf32, #tpu.memory_space<vmem>>, %arg9: memref<1x32xf32, #tpu.memory_space<vmem>>, %arg10: memref<32x128xbf16, #tpu.memory_space<vmem>>, %arg11: memref<1x128xf32, #tpu.memory_space<vmem>>, %arg12: memref<128x32xbf16, #tpu.memory_space<vmem>>, %arg13: memref<1x32xf32, #tpu.memory_space<vmem>>, %arg14: memref<1x32xf32, #tpu.memory_space<vmem>>, %arg15: memref<1x32xf32, #tpu.memory_space<vmem>>, %arg16: memref<1x8x32xf32, #tpu.memory_space<vmem>>) attributes {dimension_semantics = [#tpu.dimension_semantics<parallel>], iteration_bounds = array<i64: 2>, scalar_prefetch = 0 : i64, scratch_operands = 0 : i64, tpu.core_type = #tpu.core_type<tc>, window_params = [{transform_indices = @transform_0, window_bounds = array<i64: 1, 8, 32>}, {pipeline_mode = #tpu.pipeline_mode<synchronous>, transform_indices = @transform_1, window_bounds = array<i64: 1, 32>}, {pipeline_mode = #tpu.pipeline_mode<synchronous>, transform_indices = @transform_2, window_bounds = array<i64: 1, 32>}, {pipeline_mode = #tpu.pipeline_mode<synchronous>, transform_indices = @transform_3, window_bounds = array<i64: 32, 96>}, {pipeline_mode = #tpu.pipeline_mode<synchronous>, transform_indices = @transform_4, window_bounds = array<i64: 1, 96>}, {pipeline_mode = #tpu.pipeline_mode<synchronous>, transform_indices = @transform_5, window_bounds = array<i64: 32, 32>}, {pipeline_mode = #tpu.pipeline_mode<synchronous>, transform_indices = @transform_6, window_bounds = array<i64: 1, 32>}, {pipeline_mode = #tpu.pipeline_mode<synchronous>, transform_indices = @transform_7, window_bounds = array<i64: 1, 32>}, {pipeline_mode = #tpu.pipeline_mode<synchronous>, transform_indices = @transform_8, window_bounds = array<i64: 1, 32>}, {pipeline_mode = #tpu.pipeline_mode<synchronous>, transform_indices = @transform_9, window_bounds = array<i64: 32, 128>}, {pipeline_mode = #tpu.pipeline_mode<synchronous>, transform_indices = @transform_10, window_bounds = array<i64: 1, 128>}, {pipeline_mode = #tpu.pipeline_mode<synchronous>, transform_indices = @transform_11, window_bounds = array<i64: 128, 32>}, {pipeline_mode = #tpu.pipeline_mode<synchronous>, transform_indices = @transform_12, window_bounds = array<i64: 1, 32>}, {pipeline_mode = #tpu.pipeline_mode<synchronous>, transform_indices = @transform_13, window_bounds = array<i64: 1, 32>}, {pipeline_mode = #tpu.pipeline_mode<synchronous>, transform_indices = @transform_14, window_bounds = array<i64: 1, 32>}, {transform_indices = @transform_15, window_bounds = array<i64: 1, 8, 32>}]} {
    %c0 = arith.constant 0 : index
    %c0_0 = arith.constant 0 : index
    %c0_1 = arith.constant 0 : index
    %0 = vector.load %arg1[%c0, %c0_0, %c0_1] : memref<1x8x32xf32, #tpu.memory_space<vmem>>, vector<1x8x32xf32>
    %1 = vector.shape_cast %0 : vector<1x8x32xf32> to vector<8x32xf32>
    %c0_2 = arith.constant 0 : index
    %c0_3 = arith.constant 0 : index
    %2 = vector.load %arg2[%c0_2, %c0_3] : memref<1x32xf32, #tpu.memory_space<vmem>>, vector<1x32xf32>
    %c0_4 = arith.constant 0 : index
    %c0_5 = arith.constant 0 : index
    %3 = vector.load %arg3[%c0_4, %c0_5] : memref<1x32xf32, #tpu.memory_space<vmem>>, vector<1x32xf32>
    %cst = arith.constant dense<0.000000e+00> : vector<8xf32>
    %4 = vector.multi_reduction <add>, %1, %cst [1] : vector<8x32xf32> to vector<8xf32>
    %5 = vector.shape_cast %4 : vector<8xf32> to vector<8x1xf32>
    %cst_6 = arith.constant 3.200000e+01 : f32
    %6 = vector.broadcast %cst_6 : f32 to vector<8x1xf32>
    %7 = arith.divf %5, %6 : vector<8x1xf32>
    %8 = vector.broadcast %7 : vector<8x1xf32> to vector<8x32xf32>
    %9 = arith.subf %1, %8 : vector<8x32xf32>
    %10 = arith.mulf %9, %9 : vector<8x32xf32>
    %cst_7 = arith.constant dense<0.000000e+00> : vector<8xf32>
    %11 = vector.multi_reduction <add>, %10, %cst_7 [1] : vector<8x32xf32> to vector<8xf32>
    %12 = vector.shape_cast %11 : vector<8xf32> to vector<8x1xf32>
    %cst_8 = arith.constant 3.200000e+01 : f32
    %13 = vector.broadcast %cst_8 : f32 to vector<8x1xf32>
    %14 = arith.divf %12, %13 : vector<8x1xf32>
    %15 = vector.broadcast %7 : vector<8x1xf32> to vector<8x32xf32>
    %16 = arith.subf %1, %15 : vector<8x32xf32>
    %cst_9 = arith.constant 9.99999974E-6 : f32
    %17 = vector.broadcast %cst_9 : f32 to vector<8x1xf32>
    %18 = arith.addf %14, %17 : vector<8x1xf32>
    %19 = math.rsqrt %18 : vector<8x1xf32>
    %20 = vector.broadcast %19 : vector<8x1xf32> to vector<8x32xf32>
    %21 = arith.mulf %16, %20 : vector<8x32xf32>
    %22 = vector.broadcast %2 : vector<1x32xf32> to vector<8x32xf32>
    %23 = arith.mulf %21, %22 : vector<8x32xf32>
    %24 = vector.broadcast %3 : vector<1x32xf32> to vector<8x32xf32>
    %25 = arith.addf %23, %24 : vector<8x32xf32>
    %26 = arith.truncf %25 : vector<8x32xf32> to vector<8x32xbf16>
    %c0_10 = arith.constant 0 : index
    %c0_11 = arith.constant 0 : index
    %27 = vector.load %arg4[%c0_10, %c0_11] : memref<32x96xbf16, #tpu.memory_space<vmem>>, vector<32x96xbf16>
    %cst_12 = arith.constant dense<0.000000e+00> : vector<8x96xf32>
    %28 = tpu.matmul %26, %27, %cst_12 {dimension_numbers = #tpu.dot_dimension_numbers<[1], [0], [0], [1], [0, 0, 1, 1], [], []>} : vector<8x32xbf16>, vector<32x96xbf16>, vector<8x96xf32> -> vector<8x96xf32>
    %c0_13 = arith.constant 0 : index
    %c0_14 = arith.constant 0 : index
    %29 = vector.load %arg5[%c0_13, %c0_14] : memref<1x96xf32, #tpu.memory_space<vmem>>, vector<1x96xf32>
    %30 = vector.broadcast %29 : vector<1x96xf32> to vector<8x96xf32>
    %31 = arith.addf %28, %30 : vector<8x96xf32>
    %32 = vector.extract_strided_slice %31 {offsets = [0, 0], sizes = [8, 32], strides = [1, 1]} : vector<8x96xf32> to vector<8x32xf32>
    %cst_15 = arith.constant 0.353553385 : f32
    %33 = vector.broadcast %cst_15 : f32 to vector<8x32xf32>
    %34 = arith.mulf %32, %33 : vector<8x32xf32>
    %35 = vector.extract_strided_slice %31 {offsets = [0, 32], sizes = [8, 32], strides = [1, 1]} : vector<8x96xf32> to vector<8x32xf32>
    %36 = vector.extract_strided_slice %31 {offsets = [0, 64], sizes = [8, 32], strides = [1, 1]} : vector<8x96xf32> to vector<8x32xf32>
    %cst_16 = arith.constant 0.000000e+00 : f32
    %37 = vector.broadcast %cst_16 : f32 to vector<8x32xf32>
    %38 = vector.extract_strided_slice %34 {offsets = [0, 0], sizes = [8, 8], strides = [1, 1]} : vector<8x32xf32> to vector<8x8xf32>
    %39 = arith.truncf %38 : vector<8x8xf32> to vector<8x8xbf16>
    %40 = vector.extract_strided_slice %35 {offsets = [0, 0], sizes = [8, 8], strides = [1, 1]} : vector<8x32xf32> to vector<8x8xf32>
    %41 = arith.truncf %40 : vector<8x8xf32> to vector<8x8xbf16>
    %42 = vector.extract_strided_slice %36 {offsets = [0, 0], sizes = [8, 8], strides = [1, 1]} : vector<8x32xf32> to vector<8x8xf32>
    %43 = arith.truncf %42 : vector<8x8xf32> to vector<8x8xbf16>
    %cst_17 = arith.constant dense<0.000000e+00> : vector<8x8xf32>
    %44 = tpu.matmul %39, %41, %cst_17 {dimension_numbers = #tpu.dot_dimension_numbers<[1], [1], [0], [0], [0, 0, 1, 0], [], []>} : vector<8x8xbf16>, vector<8x8xbf16>, vector<8x8xf32> -> vector<8x8xf32>
    %cst_18 = arith.constant dense<0xFF800000> : vector<8xf32>
    %45 = vector.multi_reduction <maximumf>, %44, %cst_18 [1] : vector<8x8xf32> to vector<8xf32>
    %46 = vector.shape_cast %45 : vector<8xf32> to vector<8x1xf32>
    %47 = vector.broadcast %46 : vector<8x1xf32> to vector<8x8xf32>
    %48 = arith.subf %44, %47 : vector<8x8xf32>
    %49 = math.exp %48 : vector<8x8xf32>
    %cst_19 = arith.constant dense<0.000000e+00> : vector<8xf32>
    %50 = vector.multi_reduction <add>, %49, %cst_19 [1] : vector<8x8xf32> to vector<8xf32>
    %51 = vector.shape_cast %50 : vector<8xf32> to vector<8x1xf32>
    %cst_20 = arith.constant 1.000000e+00 : f32
    %52 = vector.broadcast %cst_20 : f32 to vector<8x1xf32>
    %53 = arith.divf %52, %51 : vector<8x1xf32>
    %54 = vector.broadcast %53 : vector<8x1xf32> to vector<8x8xf32>
    %55 = arith.mulf %49, %54 : vector<8x8xf32>
    %56 = arith.truncf %55 : vector<8x8xf32> to vector<8x8xbf16>
    %cst_21 = arith.constant dense<0.000000e+00> : vector<8x8xf32>
    %57 = tpu.matmul %56, %43, %cst_21 {dimension_numbers = #tpu.dot_dimension_numbers<[1], [0], [0], [1], [0, 0, 1, 1], [], []>} : vector<8x8xbf16>, vector<8x8xbf16>, vector<8x8xf32> -> vector<8x8xf32>
    %58 = arith.truncf %57 : vector<8x8xf32> to vector<8x8xbf16>
    %c0_22 = arith.constant 0 : index
    %c0_23 = arith.constant 0 : index
    %59 = vector.load %arg6[%c0_22, %c0_23] : memref<32x32xbf16, #tpu.memory_space<vmem>>, vector<8x32xbf16>
    %cst_24 = arith.constant dense<0.000000e+00> : vector<8x32xf32>
    %60 = tpu.matmul %58, %59, %cst_24 {dimension_numbers = #tpu.dot_dimension_numbers<[1], [0], [0], [1], [0, 0, 1, 1], [], []>} : vector<8x8xbf16>, vector<8x32xbf16>, vector<8x32xf32> -> vector<8x32xf32>
    %61 = arith.addf %37, %60 : vector<8x32xf32>
    %62 = vector.extract_strided_slice %34 {offsets = [0, 8], sizes = [8, 8], strides = [1, 1]} : vector<8x32xf32> to vector<8x8xf32>
    %63 = arith.truncf %62 : vector<8x8xf32> to vector<8x8xbf16>
    %64 = vector.extract_strided_slice %35 {offsets = [0, 8], sizes = [8, 8], strides = [1, 1]} : vector<8x32xf32> to vector<8x8xf32>
    %65 = arith.truncf %64 : vector<8x8xf32> to vector<8x8xbf16>
    %66 = vector.extract_strided_slice %36 {offsets = [0, 8], sizes = [8, 8], strides = [1, 1]} : vector<8x32xf32> to vector<8x8xf32>
    %67 = arith.truncf %66 : vector<8x8xf32> to vector<8x8xbf16>
    %cst_25 = arith.constant dense<0.000000e+00> : vector<8x8xf32>
    %68 = tpu.matmul %63, %65, %cst_25 {dimension_numbers = #tpu.dot_dimension_numbers<[1], [1], [0], [0], [0, 0, 1, 0], [], []>} : vector<8x8xbf16>, vector<8x8xbf16>, vector<8x8xf32> -> vector<8x8xf32>
    %cst_26 = arith.constant dense<0xFF800000> : vector<8xf32>
    %69 = vector.multi_reduction <maximumf>, %68, %cst_26 [1] : vector<8x8xf32> to vector<8xf32>
    %70 = vector.shape_cast %69 : vector<8xf32> to vector<8x1xf32>
    %71 = vector.broadcast %70 : vector<8x1xf32> to vector<8x8xf32>
    %72 = arith.subf %68, %71 : vector<8x8xf32>
    %73 = math.exp %72 : vector<8x8xf32>
    %cst_27 = arith.constant dense<0.000000e+00> : vector<8xf32>
    %74 = vector.multi_reduction <add>, %73, %cst_27 [1] : vector<8x8xf32> to vector<8xf32>
    %75 = vector.shape_cast %74 : vector<8xf32> to vector<8x1xf32>
    %cst_28 = arith.constant 1.000000e+00 : f32
    %76 = vector.broadcast %cst_28 : f32 to vector<8x1xf32>
    %77 = arith.divf %76, %75 : vector<8x1xf32>
    %78 = vector.broadcast %77 : vector<8x1xf32> to vector<8x8xf32>
    %79 = arith.mulf %73, %78 : vector<8x8xf32>
    %80 = arith.truncf %79 : vector<8x8xf32> to vector<8x8xbf16>
    %cst_29 = arith.constant dense<0.000000e+00> : vector<8x8xf32>
    %81 = tpu.matmul %80, %67, %cst_29 {dimension_numbers = #tpu.dot_dimension_numbers<[1], [0], [0], [1], [0, 0, 1, 1], [], []>} : vector<8x8xbf16>, vector<8x8xbf16>, vector<8x8xf32> -> vector<8x8xf32>
    %82 = arith.truncf %81 : vector<8x8xf32> to vector<8x8xbf16>
    %c8 = arith.constant 8 : index
    %c0_30 = arith.constant 0 : index
    %83 = vector.load %arg6[%c8, %c0_30] : memref<32x32xbf16, #tpu.memory_space<vmem>>, vector<8x32xbf16>
    %cst_31 = arith.constant dense<0.000000e+00> : vector<8x32xf32>
    %84 = tpu.matmul %82, %83, %cst_31 {dimension_numbers = #tpu.dot_dimension_numbers<[1], [0], [0], [1], [0, 0, 1, 1], [], []>} : vector<8x8xbf16>, vector<8x32xbf16>, vector<8x32xf32> -> vector<8x32xf32>
    %85 = arith.addf %61, %84 : vector<8x32xf32>
    %86 = vector.extract_strided_slice %34 {offsets = [0, 16], sizes = [8, 8], strides = [1, 1]} : vector<8x32xf32> to vector<8x8xf32>
    %87 = arith.truncf %86 : vector<8x8xf32> to vector<8x8xbf16>
    %88 = vector.extract_strided_slice %35 {offsets = [0, 16], sizes = [8, 8], strides = [1, 1]} : vector<8x32xf32> to vector<8x8xf32>
    %89 = arith.truncf %88 : vector<8x8xf32> to vector<8x8xbf16>
    %90 = vector.extract_strided_slice %36 {offsets = [0, 16], sizes = [8, 8], strides = [1, 1]} : vector<8x32xf32> to vector<8x8xf32>
    %91 = arith.truncf %90 : vector<8x8xf32> to vector<8x8xbf16>
    %cst_32 = arith.constant dense<0.000000e+00> : vector<8x8xf32>
    %92 = tpu.matmul %87, %89, %cst_32 {dimension_numbers = #tpu.dot_dimension_numbers<[1], [1], [0], [0], [0, 0, 1, 0], [], []>} : vector<8x8xbf16>, vector<8x8xbf16>, vector<8x8xf32> -> vector<8x8xf32>
    %cst_33 = arith.constant dense<0xFF800000> : vector<8xf32>
    %93 = vector.multi_reduction <maximumf>, %92, %cst_33 [1] : vector<8x8xf32> to vector<8xf32>
    %94 = vector.shape_cast %93 : vector<8xf32> to vector<8x1xf32>
    %95 = vector.broadcast %94 : vector<8x1xf32> to vector<8x8xf32>
    %96 = arith.subf %92, %95 : vector<8x8xf32>
    %97 = math.exp %96 : vector<8x8xf32>
    %cst_34 = arith.constant dense<0.000000e+00> : vector<8xf32>
    %98 = vector.multi_reduction <add>, %97, %cst_34 [1] : vector<8x8xf32> to vector<8xf32>
    %99 = vector.shape_cast %98 : vector<8xf32> to vector<8x1xf32>
    %cst_35 = arith.constant 1.000000e+00 : f32
    %100 = vector.broadcast %cst_35 : f32 to vector<8x1xf32>
    %101 = arith.divf %100, %99 : vector<8x1xf32>
    %102 = vector.broadcast %101 : vector<8x1xf32> to vector<8x8xf32>
    %103 = arith.mulf %97, %102 : vector<8x8xf32>
    %104 = arith.truncf %103 : vector<8x8xf32> to vector<8x8xbf16>
    %cst_36 = arith.constant dense<0.000000e+00> : vector<8x8xf32>
    %105 = tpu.matmul %104, %91, %cst_36 {dimension_numbers = #tpu.dot_dimension_numbers<[1], [0], [0], [1], [0, 0, 1, 1], [], []>} : vector<8x8xbf16>, vector<8x8xbf16>, vector<8x8xf32> -> vector<8x8xf32>
    %106 = arith.truncf %105 : vector<8x8xf32> to vector<8x8xbf16>
    %c16 = arith.constant 16 : index
    %c0_37 = arith.constant 0 : index
    %107 = vector.load %arg6[%c16, %c0_37] : memref<32x32xbf16, #tpu.memory_space<vmem>>, vector<8x32xbf16>
    %cst_38 = arith.constant dense<0.000000e+00> : vector<8x32xf32>
    %108 = tpu.matmul %106, %107, %cst_38 {dimension_numbers = #tpu.dot_dimension_numbers<[1], [0], [0], [1], [0, 0, 1, 1], [], []>} : vector<8x8xbf16>, vector<8x32xbf16>, vector<8x32xf32> -> vector<8x32xf32>
    %109 = arith.addf %85, %108 : vector<8x32xf32>
    %110 = vector.extract_strided_slice %34 {offsets = [0, 24], sizes = [8, 8], strides = [1, 1]} : vector<8x32xf32> to vector<8x8xf32>
    %111 = arith.truncf %110 : vector<8x8xf32> to vector<8x8xbf16>
    %112 = vector.extract_strided_slice %35 {offsets = [0, 24], sizes = [8, 8], strides = [1, 1]} : vector<8x32xf32> to vector<8x8xf32>
    %113 = arith.truncf %112 : vector<8x8xf32> to vector<8x8xbf16>
    %114 = vector.extract_strided_slice %36 {offsets = [0, 24], sizes = [8, 8], strides = [1, 1]} : vector<8x32xf32> to vector<8x8xf32>
    %115 = arith.truncf %114 : vector<8x8xf32> to vector<8x8xbf16>
    %cst_39 = arith.constant dense<0.000000e+00> : vector<8x8xf32>
    %116 = tpu.matmul %111, %113, %cst_39 {dimension_numbers = #tpu.dot_dimension_numbers<[1], [1], [0], [0], [0, 0, 1, 0], [], []>} : vector<8x8xbf16>, vector<8x8xbf16>, vector<8x8xf32> -> vector<8x8xf32>
    %cst_40 = arith.constant dense<0xFF800000> : vector<8xf32>
    %117 = vector.multi_reduction <maximumf>, %116, %cst_40 [1] : vector<8x8xf32> to vector<8xf32>
    %118 = vector.shape_cast %117 : vector<8xf32> to vector<8x1xf32>
    %119 = vector.broadcast %118 : vector<8x1xf32> to vector<8x8xf32>
    %120 = arith.subf %116, %119 : vector<8x8xf32>
    %121 = math.exp %120 : vector<8x8xf32>
    %cst_41 = arith.constant dense<0.000000e+00> : vector<8xf32>
    %122 = vector.multi_reduction <add>, %121, %cst_41 [1] : vector<8x8xf32> to vector<8xf32>
    %123 = vector.shape_cast %122 : vector<8xf32> to vector<8x1xf32>
    %cst_42 = arith.constant 1.000000e+00 : f32
    %124 = vector.broadcast %cst_42 : f32 to vector<8x1xf32>
    %125 = arith.divf %124, %123 : vector<8x1xf32>
    %126 = vector.broadcast %125 : vector<8x1xf32> to vector<8x8xf32>
    %127 = arith.mulf %121, %126 : vector<8x8xf32>
    %128 = arith.truncf %127 : vector<8x8xf32> to vector<8x8xbf16>
    %cst_43 = arith.constant dense<0.000000e+00> : vector<8x8xf32>
    %129 = tpu.matmul %128, %115, %cst_43 {dimension_numbers = #tpu.dot_dimension_numbers<[1], [0], [0], [1], [0, 0, 1, 1], [], []>} : vector<8x8xbf16>, vector<8x8xbf16>, vector<8x8xf32> -> vector<8x8xf32>
    %130 = arith.truncf %129 : vector<8x8xf32> to vector<8x8xbf16>
    %c24 = arith.constant 24 : index
    %c0_44 = arith.constant 0 : index
    %131 = vector.load %arg6[%c24, %c0_44] : memref<32x32xbf16, #tpu.memory_space<vmem>>, vector<8x32xbf16>
    %cst_45 = arith.constant dense<0.000000e+00> : vector<8x32xf32>
    %132 = tpu.matmul %130, %131, %cst_45 {dimension_numbers = #tpu.dot_dimension_numbers<[1], [0], [0], [1], [0, 0, 1, 1], [], []>} : vector<8x8xbf16>, vector<8x32xbf16>, vector<8x32xf32> -> vector<8x32xf32>
    %133 = arith.addf %109, %132 : vector<8x32xf32>
    %134 = arith.addf %1, %133 : vector<8x32xf32>
    %c0_46 = arith.constant 0 : index
    %c0_47 = arith.constant 0 : index
    %135 = vector.load %arg7[%c0_46, %c0_47] : memref<1x32xf32, #tpu.memory_space<vmem>>, vector<1x32xf32>
    %136 = vector.broadcast %135 : vector<1x32xf32> to vector<8x32xf32>
    %137 = arith.addf %134, %136 : vector<8x32xf32>
    %c0_48 = arith.constant 0 : index
    %c0_49 = arith.constant 0 : index
    %138 = vector.load %arg8[%c0_48, %c0_49] : memref<1x32xf32, #tpu.memory_space<vmem>>, vector<1x32xf32>
    %c0_50 = arith.constant 0 : index
    %c0_51 = arith.constant 0 : index
    %139 = vector.load %arg9[%c0_50, %c0_51] : memref<1x32xf32, #tpu.memory_space<vmem>>, vector<1x32xf32>
    %cst_52 = arith.constant dense<0.000000e+00> : vector<8xf32>
    %140 = vector.multi_reduction <add>, %137, %cst_52 [1] : vector<8x32xf32> to vector<8xf32>
    %141 = vector.shape_cast %140 : vector<8xf32> to vector<8x1xf32>
    %cst_53 = arith.constant 3.200000e+01 : f32
    %142 = vector.broadcast %cst_53 : f32 to vector<8x1xf32>
    %143 = arith.divf %141, %142 : vector<8x1xf32>
    %144 = vector.broadcast %143 : vector<8x1xf32> to vector<8x32xf32>
    %145 = arith.subf %137, %144 : vector<8x32xf32>
    %146 = arith.mulf %145, %145 : vector<8x32xf32>
    %cst_54 = arith.constant dense<0.000000e+00> : vector<8xf32>
    %147 = vector.multi_reduction <add>, %146, %cst_54 [1] : vector<8x32xf32> to vector<8xf32>
    %148 = vector.shape_cast %147 : vector<8xf32> to vector<8x1xf32>
    %cst_55 = arith.constant 3.200000e+01 : f32
    %149 = vector.broadcast %cst_55 : f32 to vector<8x1xf32>
    %150 = arith.divf %148, %149 : vector<8x1xf32>
    %151 = vector.broadcast %143 : vector<8x1xf32> to vector<8x32xf32>
    %152 = arith.subf %137, %151 : vector<8x32xf32>
    %cst_56 = arith.constant 9.99999974E-6 : f32
    %153 = vector.broadcast %cst_56 : f32 to vector<8x1xf32>
    %154 = arith.addf %150, %153 : vector<8x1xf32>
    %155 = math.rsqrt %154 : vector<8x1xf32>
    %156 = vector.broadcast %155 : vector<8x1xf32> to vector<8x32xf32>
    %157 = arith.mulf %152, %156 : vector<8x32xf32>
    %158 = vector.broadcast %138 : vector<1x32xf32> to vector<8x32xf32>
    %159 = arith.mulf %157, %158 : vector<8x32xf32>
    %160 = vector.broadcast %139 : vector<1x32xf32> to vector<8x32xf32>
    %161 = arith.addf %159, %160 : vector<8x32xf32>
    %162 = arith.truncf %161 : vector<8x32xf32> to vector<8x32xbf16>
    %c0_57 = arith.constant 0 : index
    %c0_58 = arith.constant 0 : index
    %163 = vector.load %arg10[%c0_57, %c0_58] : memref<32x128xbf16, #tpu.memory_space<vmem>>, vector<32x128xbf16>
    %cst_59 = arith.constant dense<0.000000e+00> : vector<8x128xf32>
    %164 = tpu.matmul %162, %163, %cst_59 {dimension_numbers = #tpu.dot_dimension_numbers<[1], [0], [0], [1], [0, 0, 1, 1], [], []>} : vector<8x32xbf16>, vector<32x128xbf16>, vector<8x128xf32> -> vector<8x128xf32>
    %c0_60 = arith.constant 0 : index
    %c0_61 = arith.constant 0 : index
    %165 = vector.load %arg11[%c0_60, %c0_61] : memref<1x128xf32, #tpu.memory_space<vmem>>, vector<1x128xf32>
    %166 = vector.broadcast %165 : vector<1x128xf32> to vector<8x128xf32>
    %167 = arith.addf %164, %166 : vector<8x128xf32>
    %cst_62 = arith.constant 5.000000e-01 : f32
    %168 = vector.broadcast %cst_62 : f32 to vector<8x128xf32>
    %169 = arith.mulf %168, %167 : vector<8x128xf32>
    %cst_63 = arith.constant 0.707106769 : f32
    %170 = vector.broadcast %cst_63 : f32 to vector<8x128xf32>
    %171 = arith.mulf %167, %170 : vector<8x128xf32>
    %172 = math.erf %171 : vector<8x128xf32>
    %cst_64 = arith.constant 1.000000e+00 : f32
    %173 = vector.broadcast %cst_64 : f32 to vector<8x128xf32>
    %174 = arith.addf %173, %172 : vector<8x128xf32>
    %175 = arith.mulf %169, %174 : vector<8x128xf32>
    %176 = arith.truncf %175 : vector<8x128xf32> to vector<8x128xbf16>
    %c0_65 = arith.constant 0 : index
    %c0_66 = arith.constant 0 : index
    %177 = vector.load %arg12[%c0_65, %c0_66] : memref<128x32xbf16, #tpu.memory_space<vmem>>, vector<128x32xbf16>
    %cst_67 = arith.constant dense<0.000000e+00> : vector<8x32xf32>
    %178 = tpu.matmul %176, %177, %cst_67 {dimension_numbers = #tpu.dot_dimension_numbers<[1], [0], [0], [1], [0, 0, 1, 1], [], []>} : vector<8x128xbf16>, vector<128x32xbf16>, vector<8x32xf32> -> vector<8x32xf32>
    %c0_68 = arith.constant 0 : index
    %c0_69 = arith.constant 0 : index
    %179 = vector.load %arg13[%c0_68, %c0_69] : memref<1x32xf32, #tpu.memory_space<vmem>>, vector<1x32xf32>
    %180 = vector.broadcast %179 : vector<1x32xf32> to vector<8x32xf32>
    %181 = arith.addf %178, %180 : vector<8x32xf32>
    %182 = arith.addf %137, %181 : vector<8x32xf32>
    %c0_70 = arith.constant 0 : index
    %c0_71 = arith.constant 0 : index
    %183 = vector.load %arg14[%c0_70, %c0_71] : memref<1x32xf32, #tpu.memory_space<vmem>>, vector<1x32xf32>
    %c0_72 = arith.constant 0 : index
    %c0_73 = arith.constant 0 : index
    %184 = vector.load %arg15[%c0_72, %c0_73] : memref<1x32xf32, #tpu.memory_space<vmem>>, vector<1x32xf32>
    %cst_74 = arith.constant dense<0.000000e+00> : vector<8xf32>
    %185 = vector.multi_reduction <add>, %182, %cst_74 [1] : vector<8x32xf32> to vector<8xf32>
    %186 = vector.shape_cast %185 : vector<8xf32> to vector<8x1xf32>
    %cst_75 = arith.constant 3.200000e+01 : f32
    %187 = vector.broadcast %cst_75 : f32 to vector<8x1xf32>
    %188 = arith.divf %186, %187 : vector<8x1xf32>
    %189 = vector.broadcast %188 : vector<8x1xf32> to vector<8x32xf32>
    %190 = arith.subf %182, %189 : vector<8x32xf32>
    %191 = arith.mulf %190, %190 : vector<8x32xf32>
    %cst_76 = arith.constant dense<0.000000e+00> : vector<8xf32>
    %192 = vector.multi_reduction <add>, %191, %cst_76 [1] : vector<8x32xf32> to vector<8xf32>
    %193 = vector.shape_cast %192 : vector<8xf32> to vector<8x1xf32>
    %cst_77 = arith.constant 3.200000e+01 : f32
    %194 = vector.broadcast %cst_77 : f32 to vector<8x1xf32>
    %195 = arith.divf %193, %194 : vector<8x1xf32>
    %196 = vector.broadcast %188 : vector<8x1xf32> to vector<8x32xf32>
    %197 = arith.subf %182, %196 : vector<8x32xf32>
    %cst_78 = arith.constant 9.99999974E-6 : f32
    %198 = vector.broadcast %cst_78 : f32 to vector<8x1xf32>
    %199 = arith.addf %195, %198 : vector<8x1xf32>
    %200 = math.rsqrt %199 : vector<8x1xf32>
    %201 = vector.broadcast %200 : vector<8x1xf32> to vector<8x32xf32>
    %202 = arith.mulf %197, %201 : vector<8x32xf32>
    %203 = vector.broadcast %183 : vector<1x32xf32> to vector<8x32xf32>
    %204 = arith.mulf %202, %203 : vector<8x32xf32>
    %205 = vector.broadcast %184 : vector<1x32xf32> to vector<8x32xf32>
    %206 = arith.addf %204, %205 : vector<8x32xf32>
    %c0_79 = arith.constant 0 : index
    %c0_80 = arith.constant 0 : index
    %c0_81 = arith.constant 0 : index
    %207 = vector.load %arg16[%c0_79, %c0_80, %c0_81] : memref<1x8x32xf32, #tpu.memory_space<vmem>>, vector<1x8x32xf32>
    %208 = vector.shape_cast %207 : vector<1x8x32xf32> to vector<8x32xf32>
    %209 = vector.shape_cast %206 : vector<8x32xf32> to vector<1x8x32xf32>
    tpu.vector_store %arg16[%c0_79, %c0_80, %c0_81], %209 {strides = array<i32>} : memref<1x8x32xf32, #tpu.memory_space<vmem>>, vector<1x8x32xf32>,
    return
  }
  func.func @transform_0(%arg0: i32) -> (i32, i32, i32) {
    %c0_i32 = arith.constant 0 : i32
    %c0_i32_0 = arith.constant 0 : i32
    %c0_i32_1 = arith.constant 0 : i32
    return %arg0, %c0_i32, %c0_i32_0 : i32, i32, i32
  }
  func.func @transform_1(%arg0: i32) -> (i32, i32) {
    %c0_i32 = arith.constant 0 : i32
    %c0_i32_0 = arith.constant 0 : i32
    %c0_i32_1 = arith.constant 0 : i32
    return %c0_i32, %c0_i32_0 : i32, i32
  }
  func.func @transform_2(%arg0: i32) -> (i32, i32) {
    %c0_i32 = arith.constant 0 : i32
    %c0_i32_0 = arith.constant 0 : i32
    %c0_i32_1 = arith.constant 0 : i32
    return %c0_i32, %c0_i32_0 : i32, i32
  }
  func.func @transform_3(%arg0: i32) -> (i32, i32) {
    %c0_i32 = arith.constant 0 : i32
    %c0_i32_0 = arith.constant 0 : i32
    %c0_i32_1 = arith.constant 0 : i32
    return %c0_i32, %c0_i32_0 : i32, i32
  }
  func.func @transform_4(%arg0: i32) -> (i32, i32) {
    %c0_i32 = arith.constant 0 : i32
    %c0_i32_0 = arith.constant 0 : i32
    %c0_i32_1 = arith.constant 0 : i32
    return %c0_i32, %c0_i32_0 : i32, i32
  }
  func.func @transform_5(%arg0: i32) -> (i32, i32) {
    %c0_i32 = arith.constant 0 : i32
    %c0_i32_0 = arith.constant 0 : i32
    %c0_i32_1 = arith.constant 0 : i32
    return %c0_i32, %c0_i32_0 : i32, i32
  }
  func.func @transform_6(%arg0: i32) -> (i32, i32) {
    %c0_i32 = arith.constant 0 : i32
    %c0_i32_0 = arith.constant 0 : i32
    %c0_i32_1 = arith.constant 0 : i32
    return %c0_i32, %c0_i32_0 : i32, i32
  }
  func.func @transform_7(%arg0: i32) -> (i32, i32) {
    %c0_i32 = arith.constant 0 : i32
    %c0_i32_0 = arith.constant 0 : i32
    %c0_i32_1 = arith.constant 0 : i32
    return %c0_i32, %c0_i32_0 : i32, i32
  }
  func.func @transform_8(%arg0: i32) -> (i32, i32) {
    %c0_i32 = arith.constant 0 : i32
    %c0_i32_0 = arith.constant 0 : i32
    %c0_i32_1 = arith.constant 0 : i32
    return %c0_i32, %c0_i32_0 : i32, i32
  }
  func.func @transform_9(%arg0: i32) -> (i32, i32) {
    %c0_i32 = arith.constant 0 : i32
    %c0_i32_0 = arith.constant 0 : i32
    %c0_i32_1 = arith.constant 0 : i32
    return %c0_i32, %c0_i32_0 : i32, i32
  }
  func.func @transform_10(%arg0: i32) -> (i32, i32) {
    %c0_i32 = arith.constant 0 : i32
    %c0_i32_0 = arith.constant 0 : i32
    %c0_i32_1 = arith.constant 0 : i32
    return %c0_i32, %c0_i32_0 : i32, i32
  }
  func.func @transform_11(%arg0: i32) -> (i32, i32) {
    %c0_i32 = arith.constant 0 : i32
    %c0_i32_0 = arith.constant 0 : i32
    %c0_i32_1 = arith.constant 0 : i32
    return %c0_i32, %c0_i32_0 : i32, i32
  }
  func.func @transform_12(%arg0: i32) -> (i32, i32) {
    %c0_i32 = arith.constant 0 : i32
    %c0_i32_0 = arith.constant 0 : i32
    %c0_i32_1 = arith.constant 0 : i32
    return %c0_i32, %c0_i32_0 : i32, i32
  }
  func.func @transform_13(%arg0: i32) -> (i32, i32) {
    %c0_i32 = arith.constant 0 : i32
    %c0_i32_0 = arith.constant 0 : i32
    %c0_i32_1 = arith.constant 0 : i32
    return %c0_i32, %c0_i32_0 : i32, i32
  }
  func.func @transform_14(%arg0: i32) -> (i32, i32) {
    %c0_i32 = arith.constant 0 : i32
    %c0_i32_0 = arith.constant 0 : i32
    %c0_i32_1 = arith.constant 0 : i32
    return %c0_i32, %c0_i32_0 : i32, i32
  }
  func.func @transform_15(%arg0: i32) -> (i32, i32, i32) {
    %c0_i32 = arith.constant 0 : i32
    %c0_i32_0 = arith.constant 0 : i32
    %c0_i32_1 = arith.constant 0 : i32
    return %arg0, %c0_i32, %c0_i32_0 : i32, i32, i32
  }
}

</mosaic_0001>

<bundles_post_ra>
// kernel: tpu_custom_call.1
= control target key start
LH: loop header
LB: loop body
LE: loop exit
PB: predicated region body
PF: predicated region fallthrough
CT: control target
= control target key end

     0   :  { %s2288_s0 = inlined_call_operand.vmem [shape: f32[2,8,32], index: 0, kind: input, shape index: {}]   ;;  %s2289_s1 = inlined_call_operand.vmem [shape: f32[1,32], index: 1, kind: input, shape index: {}]   ;;  %s2290_s2 = inlined_call_operand.vmem [shape: f32[1,32], index: 2, kind: input, shape index: {}]   ;;  %s2291_s3 = inlined_call_operand.vmem [shape: bf16[32,96], index: 3, kind: input, shape index: {}]   ;;  %s2292_s4 = inlined_call_operand.vmem [shape: f32[1,96], index: 4, kind: input, shape index: {}]   ;;  %s2293_s5 = inlined_call_operand.vmem [shape: bf16[32,32], index: 5, kind: input, shape index: {}]   ;;  %s2294_s6 = inlined_call_operand.vmem [shape: f32[1,32], index: 6, kind: input, shape index: {}]   ;;  %s2295_s7 = inlined_call_operand.vmem [shape: f32[1,32], index: 7, kind: input, shape index: {}]   ;;  %s2296_s8 = inlined_call_operand.vmem [shape: f32[1,32], index: 8, kind: input, shape index: {}]   ;;  %s2297_s9 = inlined_call_operand.vmem [shape: bf16[32,128], index: 9, kind: input, shape index: {}]   ;;  %s2298_s10 = inlined_call_operand.vmem [shape: f32[1,128], index: 10, kind: input, shape index: {}]   ;;  %s2299_s11 = inlined_call_operand.vmem [shape: bf16[128,32], index: 11, kind: input, shape index: {}]   ;;  %s2300_s12 = inlined_call_operand.vmem [shape: f32[1,32], index: 12, kind: input, shape index: {}]   ;;  %s2301_s13 = inlined_call_operand.vmem [shape: f32[1,32], index: 13, kind: input, shape index: {}]   ;;  %s2302_s14 = inlined_call_operand.vmem [shape: f32[1,32], index: 14, kind: input, shape index: {}]   ;;  %s2303_s15 = inlined_call_operand.hbm [shape: f32[2,8,32], index: 15, kind: output, shape index: {}]  }
   0x1   :  { %2304 = sst [smem:[#allocation5_spill]] %s2288_s0 }
   0x2   :  { %2305 = sst [smem:[#allocation6_spill]] %s2289_s1 }
   0x3   :  { %2306 = sst [smem:[#allocation7_spill]] %s2290_s2 }
   0x4   :  { %2307 = sst [smem:[#allocation8_spill]] %s2291_s3 }
   0x5   :  { %2308 = sst [smem:[#allocation9_spill]] %s2292_s4 }
   0x6   :  { %2309 = sst [smem:[#allocation10_spill]] %s2293_s5 }
   0x7   :  { %2310 = sst [smem:[#allocation11_spill]] %s2294_s6 }
   0x8   :  { %20 = vsyncpa [#allocation3], 0 }
   0x9   :  { %22 = vsyncpa [#allocation3 + $0x1], 0  ;;  %s1996_s18 = smov 0   ;;  %s1998_s19 = smov 0  }
   0xa   :  { %s2000_s20 = smov 0   ;;  %s2002_s21 = smov 0  }
   0xb LB: > { %s2017_s22 = sadd.s32 4294967295, %s1900_s21   ;;  %s1559_s23 = sadd.s32 4294967294, %s1900_s21   ;;  %s1900_s21 = sphi %s2002_s21, %s2323_s21   ;;  %s1896_s20 = sphi %s2000_s20, %s2322_s20   ;;  %s1892_s19 = sphi %s1998_s19, %s2321_s19   ;;  %s1888_s18 = sphi %s1996_s18, %s2320_s18  }
   0xc   : > { %s2021_s24 = sadd.s32 1, %s1900_s21   ;;  %s355_s25 = sadd.s32 1, %s1896_s20 }
   0xd   : > { %s352_s26 = ssub.s32 %s1900_s21, %s2021_s24  ;;  %p365_p0 = scmp.ne.s32.totalorder %s1896_s20, %s1892_s19 }
   0xe   : > { %p353_p1 = scmp.eq.s32.totalorder %s352_s26, 0  ;;  %p366_p2 = scmp.eq.s32.totalorder %s2017_s22, 1 }
   0xf   : > { %p371_p3 = scmp.ne.s32.totalorder %s1892_s19, %s1888_s18  ;;  %p372_p4 = scmp.eq.s32.totalorder %s1559_s23, 1 }
  0x10   : > { %s2032_s27 = scalar_select %p353_p1, %s1896_s20, %s355_s25  }
  0x11   : > { %p2034_p5 = por %p366_p2, %p365_p0  ;;  %p2038_p6 = por %p372_p4, %p371_p3 }
  0x12   : > { %p1562_p7 = scmp.ge.s32.totalorder %s1900_s21, 1  ;;  %p439_p8 = scmp.lt.s32.totalorder %s1900_s21, 3 }
  0x14   : > { %p440_p9 = pnand %p1562_p7, %p439_p8 }
  0x15   : > { %p486_p10 = scmp.lt.s32.totalorder (!%p440_p9), %s2017_s22, 1  ;;  %s2313_s0 = sld [smem:[#allocation5_spill]] (!%p440_p9) }
  0x16   : > { %443 = sbr.rel (%p440_p9) target bundleno = 4348 (0x10fc), region = 80  ;;  %s2314_s3 = sld [smem:[#allocation8_spill]] (!%p440_p9) }
  0x17   : > { %s2315_s1 = sld [smem:[#allocation6_spill]] (!%p440_p9)  ;;  %s1904_s23 = smov (!%p440_p9), 64  }
  0x18   : > { %s2316_s2 = sld [smem:[#allocation7_spill]] (!%p440_p9)  ;;  %s1906_s26 = smov (!%p440_p9), 88  }
  0x19   : > { %s2317_s4 = sld [smem:[#allocation9_spill]] (!%p440_p9)  ;;  %s1909_s17 = smov (!%p440_p9), 80  }
  0x1a   : > { %s2318_s5 = sld [smem:[#allocation10_spill]] (!%p440_p9) }
  0x1b   : > { %s487_s30 = scalar_select %p486_p10, %s2017_s22, 1  ;;  %vm494_vm0 = vcmask 261120   ;;  %v1902_v8 = vmov 0.0   ;;  %vm1903_vm1 = vmmov 0   ;;  %vm596_vm2 = vcmask 64512  }
  0x1c   : > { %v1804_v7 = vld [vmem:[%s2314_s3 + $0x8] sm:$0xff]   ;;  %1644 = vmatprep.subr.bf16.mxu1 %v1902_v8  ;;  %1648 = vmatprep.mubr.msk.bf16.mxu1 %vm1903_vm1, %v1902_v8  ;;  %v1805_v9 = vld [vmem:[%s2314_s3] sm:$0xff]   ;;  %vm661_vm3 = vcmask 1043456   ;;  %s2319_s6 = sld [smem:[#allocation11_spill]] }
  0x1d   : > { %s1564_s16 = sshll.u32 %s487_s30, 3  ;;  %1645 = vmatpush3.bf16.msra.mxu1 %v1804_v7  ;;  %1670 = vmatprep.subr.bf16.mxu0 %v1902_v8  ;;  %v1565_v14 = vld [vmem:[%s2315_s1] ss:$0 sm:$0xff]  ;;  %s1907_s30 = smov 120  }
  0x1e   : > { %s489_s25 = scalar_lea.vmem %s2313_s0, %s1564_s16  ;;  %1646 = vmatprep.subr.bf16.mxu1 %v1902_v8  ;;  %1672 = vmatprep.mubr.msk.bf16.mxu0 %vm1903_vm1, %v1902_v8  ;;  %v1566_v16 = vld [vmem:[%s2316_s2] ss:$0 sm:$0xff]  ;;  %s1908_s16 = smov 56  }
  0x1f   : > { %v2049_v0 = vld [vmem:[%s489_s25] sm:$0xff]  ;;  %s1905_s25 = smov 96   ;;  %s483_s0 = sand.u32 1, %s1892_s19  }
  0x20   : > { %v495_v1 = vsel %vm494_vm0, %v2049_v0, 0.0  ;;  %v1567_v20 = vld [vmem:[%s2317_s4] ss:$0 sm:$0xff]  ;;  %s1563_s1 = sshll.u32 %s483_s0, 3 }
  0x21   : > { %496 = vadd.xlane.f32.xlu0 %v495_v1  ;;  %1647 = vmatpush3.bf16.msra.mxu1 %v1805_v9  ;;  %v706_v7 = vld [vmem:[%s2318_s5] sm:$0xf] }
  0x22   : > { %1652 = vmatprep.subr.bf16.mxu1 %v1902_v8 }
  0xaa   : > { %v497_v2 = vpop.xlane.xlu0 %496 }
  0xab   : > { %v499_v3 = vmul.f32 0.03125, %v497_v2 }
  0xad   : > { %v500_v4 = vsub.f32 %v2049_v0, %v499_v3  ;;  %v820_v3 = vld [vmem:[%s2318_s5 + $0x4] sm:$0xf] }
  0xaf   : > { %v501_v5 = vmul.f32 %v500_v4, %v500_v4 }
  0xb1   : > { %v502_v6 = vsel %vm494_vm0, %v501_v5, 0.0 }
  0xb2   : > { %503 = vadd.xlane.f32.xlu0 %v502_v6 }
 0x13b   : > { %v504_v10 = vpop.xlane.xlu0 %503 }
 0x13c   : > { %v505_v11 = vmul.f32 0.03125, %v504_v10 }
 0x13e   : > { %v506_v12 = vadd.f32 1e-05, %v505_v11  ;;  %v871_v11 = vsel %vm661_vm3, %v706_v7, 0 }
 0x140   : > { %1816 = vrsqrt.f32 %v506_v12 }
 0x14d   : > { %v1817_v13 = vpop.eup %1816 }
 0x14e   : > { %v508_v15 = vmul.f32 %v1817_v13, %v500_v4  ;;  %v825_v4 = vsel %vm661_vm3, %v820_v3, 0 }
 0x150   : > { %v515_v17 = vmul.f32 %v1565_v14, %v508_v15 }
 0x152   : > { %v522_v18 = vadd.f32 %v1566_v16, %v515_v17 }
 0x154   : > { %v523_v19 = vpack.c.bf16 %v522_v18, %v522_v18 }
 0x156   : > { %1649 = vmatmul.mubr.msk.bf16.vlgmr.msra.gmra.mxu1 %vm494_vm0, %v523_v19 }
 0x157   : > { %1654 = vmatprep.mubr.msk.bf16.mxu1 %vm1903_vm1, %v1902_v8 }
 0x216   : > { %v584_v21 = vpop.f32.mrf.mxu1 }
 0x217   : > { %v585_v22 = vadd.f32 %v1567_v20, %v584_v21 }
 0x218   : > { %v1650_v23 = vpop.f32.mrf.mxu1 }
 0x219   : > { %v2081_v24 = vpack.c.bf16 %v585_v22, %v585_v22  ;;  %v590_v29 = vmul.f32 0.35355338, %v585_v22 }
 0x21a   : > { %v587_v25 = vpop.f32.mrf.mxu1 }
 0x21b   : > { %656 = vrot.lane.b32.xlu0 %v2081_v24, %s1904_s23  ;;  %594 = vrot.lane.b32.xlu1 %v2081_v24, %s1905_s25  ;;  %v2087_v31 = vpack.c.bf16 %v590_v29, %v590_v29  ;;  %s1910_s23 = smov 112   ;;  %s1911_s25 = smov 48  }
 0x21c   : > { %v1651_v26 = vpop.f32.mrf.mxu1 }
 0x28d   : > { %v595_v27 = vpop.permute.xlu1 %594  ;;  %v657_v30 = vpop.permute.xlu0 %656 }
 0x28e   : > { %v601_v28 = vsel %vm596_vm2, %v595_v27, 0  ;;  %v663_v32 = vsel %vm661_vm3, %v657_v30, 0 }
 0x28f   : > { %1653 = vmatpush3.bf16.xpose.msra.mxu1 %v601_v28 }
 0x290   : > { %1658 = vmatprep.subr.bf16.mxu1 %v1902_v8 }
 0x296   : > { %1655 = vmatmul.mubr.msk.bf16.vlgmr.msra.gmra.mxu1 %vm596_vm2, %v2087_v31 }
 0x297   : > { %1659 = vmatpush3.bf16.msra.mxu1 %v663_v32  ;;  %1660 = vmatprep.mubr.msk.bf16.mxu1 %vm1903_vm1, %v1902_v8 }
 0x298   : > { %1664 = vmatprep.subr.bf16.mxu1 %v1902_v8 }
 0x356   : > { %v637_v33 = vpop.f32.mrf.mxu1 }
 0x357   : > { %v643_v34 = vsel %vm596_vm2, %v637_v33, -inf }
 0x358   : > { %644 = vmax.xlane.f32.xlu1 %v643_v34  ;;  %v1656_v35 = vpop.f32.mrf.mxu1 }
 0x35a   : > { %v640_v36 = vpop.f32.mrf.mxu1 }
 0x35c   : > { %v1657_v37 = vpop.f32.mrf.mxu1 }
 0x3e1   : > { %v645_v38 = vpop.xlane.xlu1 %644 }
 0x3e2   : > { %v646_v39 = vsub.f32 %v637_v33, %v645_v38 }
 0x3e4   : > { %v647_v40 = vmul.f32 1.442695, %v646_v39 }
 0x3e6   : > { %1818 = vpow2.f32 %v647_v40 }
 0x3f3   : > { %v1819_v41 = vpop.eup %1818 }
 0x3f4   : > { %v649_v42 = vsel %vm596_vm2, %v1819_v41, 0.0 }
 0x3f5   : > { %650 = vadd.xlane.f32.xlu0 %v649_v42 }
 0x40b   : > { %710 = vrot.lane.b32.xlu0 %v2081_v24, %s1906_s26  ;;  %s1915_s26 = smov [#allocation2]  }
 0x40f   : > { %708 = vrot.lane.b32.xlu0 %v2087_v31, %s1907_s30  ;;  %s1844_s30 = sshll.u32 %s1915_s26, 4  ;;  %s1845_s30 = int_to_ptr.vmem [resolvable:$false] %s1844_s30 }
 0x47e   : > { %v651_v43 = vpop.xlane.xlu0 %650 }
 0x47f   : > { %1820 = vrcp.f32 %v651_v43 }
 0x482   : > { %v711_v46 = vpop.permute.xlu0 %710 }
 0x483   : > { %v716_v48 = vsel %vm596_vm2, %v711_v46, 0 }
 0x486   : > { %v709_v49 = vpop.permute.xlu0 %708 }
 0x48c   : > { %v1821_v44 = vpop.eup %1820 }
 0x48d   : > { %v654_v45 = vmul.f32 %v1821_v44, %v1819_v41 }
 0x48f   : > { %v655_v47 = vpack.c.bf16 %v654_v45, %v654_v45 }
 0x491   : > { %1661 = vmatmul.mubr.msk.bf16.vlgmr.msra.gmra.mxu1 %vm596_vm2, %v655_v47 }
 0x492   : > { %1665 = vmatpush3.bf16.xpose.msra.mxu1 %v716_v48  ;;  %1666 = vmatprep.mubr.msk.bf16.mxu1 %vm1903_vm1, %v1902_v8 }
 0x493   : > { %1676 = vmatprep.subr.bf16.mxu1 %v1902_v8 }
 0x499   : > { %1667 = vmatmul.mubr.msk.bf16.vlgmr.msra.gmra.mxu1 %vm596_vm2, %v709_v49 }
 0x49a   : > { %1678 = vmatprep.mubr.msk.bf16.mxu1 %vm1903_vm1, %v1902_v8  ;;  %1677 = vmatpush3.bf16.msra.mxu1 %v825_v4 }
 0x49b   : > { %1688 = vmatprep.subr.bf16.mxu1 %v1902_v8 }
 0x551   : > { %v699_v50 = vpop.f32.mrf.mxu1 }
 0x552   : > { %v705_v13 = vpack.c.bf16 %v699_v50, %v699_v50 }
 0x553   : > { %v1662_v51 = vpop.f32.mrf.mxu1 }
 0x555   : > { %v702_v52 = vpop.f32.mrf.mxu1 }
 0x557   : > { %v1663_v53 = vpop.f32.mrf.mxu1 }
 0x559   : > { %v752_v54 = vpop.f32.mrf.mxu1 }
 0x55a   : > { %v758_v55 = vsel %vm596_vm2, %v752_v54, -inf }
 0x55b   : > { %759 = vmax.xlane.f32.xlu1 %v758_v55  ;;  %v1668_v56 = vpop.f32.mrf.mxu1 }
 0x55d   : > { %v755_v57 = vpop.f32.mrf.mxu1 }
 0x55f   : > { %v1669_v58 = vpop.f32.mrf.mxu1 }
 0x56c   : > { %771 = vrot.lane.b32.xlu1 %v2081_v24, %s1908_s16  ;;  %s1914_s16 = smov 40  }
 0x570   : > { %915 = vrot.lane.b32.xlu1 %v2081_v24, %s1909_s17  ;;  %s1602_s17 = sshll.u32 %s2017_s22, 7  ;;  %s1846_s22 = scalar_lea.vmem %s1845_s30, 256 }
 0x574   : > { %913 = vrot.lane.b32.xlu1 %v2087_v31, %s1910_s23  ;;  %s1912_s23 = smov 72  }
 0x5e4   : > { %v760_v59 = vpop.xlane.xlu1 %759 }
 0x5e5   : > { %v761_v60 = vsub.f32 %v752_v54, %v760_v59 }
 0x5e7   : > { %v762_v61 = vmul.f32 1.442695, %v761_v60 }
 0x5e8   : > { %v772_v62 = vpop.permute.xlu1 %771 }
 0x5e9   : > { %1822 = vpow2.f32 %v762_v61  ;;  %v777_v63 = vsel %vm661_vm3, %v772_v62, 0 }
 0x5ea   : > { %1671 = vmatpush3.bf16.msra.mxu0 %v777_v63 }
 0x5eb   : > { %1682 = vmatprep.subr.bf16.mxu0 %v1902_v8 }
 0x5ec   : > { %v916_v15 = vpop.permute.xlu1 %915 }
 0x5ed   : > { %v921_v19 = vsel %vm596_vm2, %v916_v15, 0 }
 0x5f0   : > { %v914_v23 = vpop.permute.xlu1 %913 }
 0x5f6   : > { %v1823_v1 = vpop.eup %1822 }
 0x5f7   : > { %v764_v2 = vsel %vm596_vm2, %v1823_v1, 0.0 }
 0x5f8   : > { %765 = vadd.xlane.f32.xlu0 %v764_v2 }
 0x60e   : > { %976 = vrot.lane.b32.xlu0 %v2081_v24, %s1911_s25  ;;  %s1913_s25 = smov 104  }
 0x681   : > { %v766_v5 = vpop.xlane.xlu0 %765 }
 0x682   : > { %1824 = vrcp.f32 %v766_v5 }
 0x685   : > { %v977_v12 = vpop.permute.xlu0 %976 }
 0x686   : > { %v982_v14 = vsel %vm661_vm3, %v977_v12, 0 }
 0x68f   : > { %v1825_v6 = vpop.eup %1824 }
 0x690   : > { %v769_v9 = vmul.f32 %v1825_v6, %v1823_v1 }
 0x692   : > { %v770_v10 = vpack.c.bf16 %v769_v9, %v769_v9 }
 0x694   : > { %1673 = vmatmul.mubr.msk.bf16.vlgmr.msra.gmra.mxu0 %vm596_vm2, %v770_v10 }
 0x695   : > { %1683 = vmatpush3.bf16.msra.mxu0 %v871_v11  ;;  %1684 = vmatprep.mubr.msk.bf16.mxu0 %vm1903_vm1, %v1902_v8 }
 0x696   : > { %1694 = vmatprep.subr.bf16.mxu0 %v1902_v8 }
 0x69c   : > { %1685 = vmatmul.mubr.msk.bf16.vlgmr.msra.gmra.mxu0 %vm596_vm2, %v705_v13 }
 0x69d   : > { %1695 = vmatpush3.bf16.msra.mxu0 %v982_v14  ;;  %1696 = vmatprep.mubr.msk.bf16.mxu0 %vm1903_vm1, %v1902_v8 }
 0x69e   : > { %1706 = vmatprep.subr.bf16.mxu0 %v1902_v8 }
 0x754   : > { %v813_v16 = vpop.f32.mrf.mxu0 }
 0x755   : > { %v819_v17 = vpack.c.bf16 %v813_v16, %v813_v16 }
 0x756   : > { %v1674_v18 = vpop.f32.mrf.mxu0 }
 0x757   : > { %1679 = vmatmul.mubr.msk.bf16.vlgmr.msra.gmra.mxu1 %vm596_vm2, %v819_v17 }
 0x758   : > { %1689 = vmatpush3.bf16.xpose.msra.mxu1 %v921_v19  ;;  %v816_v20 = vpop.f32.mrf.mxu0  ;;  %1690 = vmatprep.mubr.msk.bf16.mxu1 %vm1903_vm1, %v1902_v8 }
 0x759   : > { %1700 = vmatprep.subr.bf16.mxu1 %v1902_v8 }
 0x75a   : > { %v1675_v21 = vpop.f32.mrf.mxu0 }
 0x75c   : > { %v2138_v22 = vpop.f32.mrf.mxu0 }
 0x75e   : > { %v1686_v25 = vpop.f32.mrf.mxu0 }
 0x75f   : > { %1691 = vmatmul.mubr.msk.bf16.vlgmr.msra.gmra.mxu1 %vm596_vm2, %v914_v23  ;;  %v1583_v25 = vld [vmem:[%s2319_s6] ss:$0 sm:$0xff]  ;;  %s1487_s6 = scalar_lea.sflag [#allocation3], %s483_s0 }
 0x760   : > { %v910_v26 = vpop.f32.mrf.mxu0  ;;  %1702 = vmatprep.mubr.msk.bf16.mxu1 %vm1903_vm1, %v1902_v8 }
 0x762   : > { %v1687_v27 = vpop.f32.mrf.mxu0 }
 0x817   : > { %v2143_v28 = vpop.f32.mrf.mxu1 }
 0x818   : > { %v908_v5 = vadd.f32 %v2138_v22, %v2143_v28 }
 0x819   : > { %v1680_v29 = vpop.f32.mrf.mxu1 }
 0x81b   : > { %v864_v30 = vpop.f32.mrf.mxu1 }
 0x81d   : > { %v1681_v32 = vpop.f32.mrf.mxu1 }
 0x81f   : > { %v957_v33 = vpop.f32.mrf.mxu1 }
 0x820   : > { %v963_v34 = vsel %vm596_vm2, %v957_v33, -inf }
 0x821   : > { %964 = vmax.xlane.f32.xlu1 %v963_v34  ;;  %v1692_v35 = vpop.f32.mrf.mxu1 }
 0x823   : > { %v960_v36 = vpop.f32.mrf.mxu1 }
 0x825   : > { %v1693_v37 = vpop.f32.mrf.mxu1 }
 0x8aa   : > { %v965_v38 = vpop.xlane.xlu1 %964 }
 0x8ab   : > { %v966_v39 = vsub.f32 %v957_v33, %v965_v38  ;;  %v1807_v38 = vld [vmem:[%s2297_s9] sm:$0xff]  }
 0x8ad   : > { %v967_v40 = vmul.f32 1.442695, %v966_v39  ;;  %v1808_v39 = vld [vmem:[%s2299_s11 + $0x38] sm:$0xff]  }
 0x8af   : > { %1826 = vpow2.f32 %v967_v40  ;;  %v1809_v40 = vld [vmem:[%s2299_s11 + $0x30] sm:$0xff]  }
 0x8bc   : > { %v1827_v41 = vpop.eup %1826 }
 0x8bd   : > { %v969_v42 = vsel %vm596_vm2, %v1827_v41, 0.0 }
 0x8be   : > { %970 = vadd.xlane.f32.xlu0 %v969_v42 }
 0x8d4   : > { %1075 = vrot.lane.b32.xlu0 %v2081_v24, %s1912_s23  ;;  %s485_s23 = scalar_lea.vmem [#allocation2], %s1563_s1 }
 0x8d5   : > { %s1500_s2 = sshll.u32 %s485_s23, 4  ;;  %s1501_s2 = int_to_ptr.vmem [resolvable:$true] %s1500_s2 }
 0x8d6   : > { %p1847_p0 = scmp.lt.s32.totalorder %s1501_s2, %s1845_s30 }
 0x8d8   : > { %1073 = vrot.lane.b32.xlu0 %v2087_v31, %s1913_s25  ;;  %v1025_v31 = vld [vmem:[%s2318_s5 + $0x8] sm:$0xf]  ;;  %s1840_s25 = scalar_lea.vmem %s1501_s2, 128 }
 0x8d9   : > { %v1030_v50 = vsel %vm661_vm3, %v1025_v31, 0  ;;  %p1841_p11 = scmp.ne.s32.totalorder %s1501_s2, %s1840_s25  ;;  %p1848_p1 = scmp.lt.s32.totalorder %s1846_s22, %s1840_s25 }
 0x8da   : > { %1701 = vmatpush3.bf16.msra.mxu1 %v1030_v50  ;;  %v1810_v50 = vld [vmem:[%s2299_s11 + $0x28] sm:$0xff]  }
 0x8db   : > { %1712 = vmatprep.subr.bf16.mxu1 %v1902_v8  ;;  %p1842_p12 = pnand %p1841_p11, %p2034_p5  ;;  %p1849_p2 = por %p1848_p1, %p1847_p0 }
 0x8dd   : > { %p1843_p13 = pneg %p1842_p12 }
 0x8df   : > { %p1850_p3 = pnand %p1849_p2, %p1843_p13 }
 0x947   : > { %v971_v43 = vpop.xlane.xlu0 %970 }
 0x948   : > { %1828 = vrcp.f32 %v971_v43 }
 0x94b   : > { %v1076_v46 = vpop.permute.xlu0 %1075 }
 0x94c   : > { %v1081_v48 = vsel %vm596_vm2, %v1076_v46, 0 }
 0x94f   : > { %v1074_v49 = vpop.permute.xlu0 %1073 }
 0x955   : > { %v1829_v44 = vpop.eup %1828 }
 0x956   : > { %v974_v45 = vmul.f32 %v1829_v44, %v1827_v41 }
 0x958   : > { %v975_v47 = vpack.c.bf16 %v974_v45, %v974_v45  ;;  %v1584_v45 = vld [vmem:[%s2295_s7] ss:$0 sm:$0xff] }
 0x95a   : > { %1697 = vmatmul.mubr.msk.bf16.vlgmr.msra.gmra.mxu0 %vm596_vm2, %v975_v47  ;;  %v1585_v47 = vld [vmem:[%s2296_s8] ss:$0 sm:$0xff] }
 0x95b   : > { %1707 = vmatpush3.bf16.xpose.msra.mxu0 %v1081_v48  ;;  %1708 = vmatprep.mubr.msk.bf16.mxu0 %vm1903_vm1, %v1902_v8 }
 0x95c   : > { %1718 = vmatprep.subr.bf16.mxu0 %v1902_v8 }
 0x962   : > { %1709 = vmatmul.mubr.msk.bf16.vlgmr.msra.gmra.mxu0 %vm596_vm2, %v1074_v49 }
 0x963   : > { %1720 = vmatprep.mubr.msk.bf16.mxu0 %vm1903_vm1, %v1902_v8 }
 0xa1a   : > { %v1018_v51 = vpop.f32.mrf.mxu0 }
 0xa1b   : > { %v1024_v52 = vpack.c.bf16 %v1018_v51, %v1018_v51  ;;  %v1811_v51 = vld [vmem:[%s2299_s11 + $0x20] sm:$0xff]  }
 0xa1c   : > { %v1698_v53 = vpop.f32.mrf.mxu0 }
 0xa1d   : > { %1703 = vmatmul.mubr.msk.bf16.vlgmr.msra.gmra.mxu1 %vm596_vm2, %v1024_v52  ;;  %v1812_v52 = vld [vmem:[%s2299_s11 + $0x18] sm:$0xff]   ;;  %v1813_v53 = vld [vmem:[%s2299_s11 + $0x10] sm:$0xff]  }
 0xa1e   : > { %v1021_v54 = vpop.f32.mrf.mxu0  ;;  %1714 = vmatprep.mubr.msk.bf16.mxu1 %vm1903_vm1, %v1902_v8 }
 0xa1f   : > { %v1814_v54 = vld [vmem:[%s2299_s11 + $0x8] sm:$0xff]  }
 0xa20   : > { %v1699_v55 = vpop.f32.mrf.mxu0 }
 0xa21   : > { %v1815_v55 = vld [vmem:[%s2299_s11] sm:$0xff]  }
 0xa22   : > { %v1117_v56 = vpop.f32.mrf.mxu0 }
 0xa23   : > { %v1123_v57 = vsel %vm596_vm2, %v1117_v56, -inf }
 0xa24   : > { %1124 = vmax.xlane.f32.xlu1 %v1123_v57  ;;  %v1710_v58 = vpop.f32.mrf.mxu0 }
 0xa26   : > { %v1120_v59 = vpop.f32.mrf.mxu0 }
 0xa28   : > { %v1711_v60 = vpop.f32.mrf.mxu0 }
 0xa35   : > { %1136 = vrot.lane.b32.xlu1 %v2081_v24, %s1914_s16  ;;  %v1185_v24 = vld [vmem:[%s2318_s5 + $0xc] sm:$0xf]  ;;  %s1498_s5 = scalar_lea.hbm %s2303_s15, %s1602_s17 }
 0xa36   : > { %v1190_v9 = vsel %vm661_vm3, %v1185_v24, 0 }
 0xa37   : > { %1719 = vmatpush3.bf16.msra.mxu0 %v1190_v9 }
 0xa38   : > { %1732 = vmatprep.subr.bf16.mxu0 %v1902_v8 }
 0xaad   : > { %v1125_v61 = vpop.xlane.xlu1 %1124 }
 0xaae   : > { %v1126_v62 = vsub.f32 %v1117_v56, %v1125_v61  ;;  %v1586_v56 = vld [vmem:[%s2298_s10] ss:$0 sm:$0xff] }
 0xab0   : > { %v1127_v63 = vmul.f32 1.442695, %v1126_v62 }
 0xab1   : > { %v1137_v1 = vpop.permute.xlu1 %1136 }
 0xab2   : > { %1830 = vpow2.f32 %v1127_v63  ;;  %v1142_v2 = vsel %vm661_vm3, %v1137_v1, 0 }
 0xab3   : > { %1713 = vmatpush3.bf16.msra.mxu1 %v1142_v2 }
 0xab4   : > { %1724 = vmatprep.subr.bf16.mxu1 %v1902_v8 }
 0xabf   : > { %v1831_v3 = vpop.eup %1830 }
 0xac0   : > { %v1129_v4 = vsel %vm596_vm2, %v1831_v3, 0.0 }
 0xac1   : > { %1130 = vadd.xlane.f32.xlu0 %v1129_v4  ;;  %v1590_v4 = vld [vmem:[%s2300_s12] ss:$0 sm:$0xff] }
 0xadd   : > { %v1066_v6 = vpop.f32.mrf.mxu1 }
 0xade   : > { %v1072_v7 = vadd.f32 %v1066_v6, %v908_v5 }
 0xadf   : > { %v1704_v10 = vpop.f32.mrf.mxu1 }
 0xae1   : > { %v1069_v11 = vpop.f32.mrf.mxu1 }
 0xae3   : > { %v1705_v12 = vpop.f32.mrf.mxu1 }
 0xb4a   : > { %v1131_v13 = vpop.xlane.xlu0 %1130 }
 0xb4b   : > { %1832 = vrcp.f32 %v1131_v13 }
 0xb58   : > { %v1833_v14 = vpop.eup %1832 }
 0xb59   : > { %v1134_v15 = vmul.f32 %v1833_v14, %v1831_v3 }
 0xb5b   : > { %v1135_v16 = vpack.c.bf16 %v1134_v15, %v1134_v15 }
 0xb5d   : > { %1715 = vmatmul.mubr.msk.bf16.vlgmr.msra.gmra.mxu1 %vm596_vm2, %v1135_v16 }
 0xb5e   : > { %1728 = vmatprep.mubr.msk.bf16.mxu1 %vm1903_vm1, %v1902_v8 }
 0xc1d   : > { %v1178_v17 = vpop.f32.mrf.mxu1 }
 0xc1e   : > { %v1184_v18 = vpack.c.bf16 %v1178_v17, %v1178_v17 }
 0xc1f   : > { %v1716_v19 = vpop.f32.mrf.mxu1 }
 0xc20   : > { %1721 = vmatmul.mubr.msk.bf16.vlgmr.msra.gmra.mxu0 %vm596_vm2, %v1184_v18 }
 0xc21   : > { %v1181_v20 = vpop.f32.mrf.mxu1  ;;  %1748 = vmatprep.mubr.msk.bf16.mxu0 %vm1903_vm1, %v1902_v8  ;;  %1733 = vmatpush3.bf16.msra.mxu0 %v1808_v39 }
 0xc22   : > { %1734 = vmatprep.subr.bf16.mxu0 %v1902_v8 }
 0xc23   : > { %v1717_v21 = vpop.f32.mrf.mxu1 }
 0xc24   : > { %v1599_v21 = vld [vmem:[%s2301_s13] ss:$0 sm:$0xff] }
 0xc25   : > { %1735 = vmatpush3.bf16.msra.mxu0 %v1809_v40 }
 0xc26   : > { %1736 = vmatprep.subr.bf16.mxu0 %v1902_v8 }
 0xc29   : > { %1737 = vmatpush3.bf16.msra.mxu0 %v1810_v50 }
 0xc2a   : > { %1738 = vmatprep.subr.bf16.mxu0 %v1902_v8 }
 0xc2d   : > { %1739 = vmatpush3.bf16.msra.mxu0 %v1811_v51 }
 0xc2e   : > { %1740 = vmatprep.subr.bf16.mxu0 %v1902_v8 }
 0xc31   : > { %1741 = vmatpush3.bf16.msra.mxu0 %v1812_v52 }
 0xc32   : > { %1742 = vmatprep.subr.bf16.mxu0 %v1902_v8 }
 0xc35   : > { %1743 = vmatpush3.bf16.msra.mxu0 %v1813_v53 }
 0xc36   : > { %1744 = vmatprep.subr.bf16.mxu0 %v1902_v8 }
 0xc39   : > { %1745 = vmatpush3.bf16.msra.mxu0 %v1814_v54 }
 0xc3a   : > { %1746 = vmatprep.subr.bf16.mxu0 %v1902_v8 }
 0xc3d   : > { %1747 = vmatpush3.bf16.msra.mxu0 %v1815_v55 }
 0xce0   : > { %v1226_v22 = vpop.f32.mrf.mxu0 }
 0xce1   : > { %v1232_v23 = vadd.f32 %v1226_v22, %v1072_v7 }
 0xce2   : > { %v1722_v26 = vpop.f32.mrf.mxu0 }
 0xce3   : > { %v1233_v27 = vadd.f32 %v1232_v23, %v2049_v0  ;;  %v1806_v0 = vld [vmem:[%s2297_s9 + $0x8] sm:$0xff]   ;;  %v1600_v23 = vld [vmem:[%s2302_s14] ss:$0 sm:$0xff] }
 0xce4   : > { %v1229_v28 = vpop.f32.mrf.mxu0  ;;  %1725 = vmatpush3.bf16.msra.mxu1 %v1806_v0 }
 0xce5   : > { %v2187_v29 = vadd.f32 %v1583_v25, %v1233_v27  ;;  %1726 = vmatprep.subr.bf16.mxu1 %v1902_v8 }
 0xce6   : > { %v1723_v30 = vpop.f32.mrf.mxu0 }
 0xce7   : > { %v1244_v32 = vsel %vm494_vm0, %v2187_v29, 0.0 }
 0xce8   : > { %1245 = vadd.xlane.f32.xlu1 %v1244_v32  ;;  %1727 = vmatpush3.bf16.msra.mxu1 %v1807_v38 }
 0xd71   : > { %v1246_v33 = vpop.xlane.xlu1 %1245 }
 0xd72   : > { %v1247_v34 = vmul.f32 0.03125, %v1246_v33 }
 0xd74   : > { %v1248_v35 = vsub.f32 %v2187_v29, %v1247_v34 }
 0xd76   : > { %v1249_v36 = vmul.f32 %v1248_v35, %v1248_v35 }
 0xd78   : > { %v1250_v37 = vsel %vm494_vm0, %v1249_v36, 0.0 }
 0xd79   : > { %1251 = vadd.xlane.f32.xlu0 %v1250_v37 }
 0xe02   : > { %v1252_v41 = vpop.xlane.xlu0 %1251 }
 0xe03   : > { %v1253_v42 = vmul.f32 0.03125, %v1252_v41 }
 0xe05   : > { %v1254_v43 = vadd.f32 1e-05, %v1253_v42 }
 0xe07   : > { %1834 = vrsqrt.f32 %v1254_v43 }
 0xe14   : > { %v1835_v44 = vpop.eup %1834 }
 0xe15   : > { %v1256_v46 = vmul.f32 %v1835_v44, %v1248_v35 }
 0xe17   : > { %v1263_v48 = vmul.f32 %v1584_v45, %v1256_v46 }
 0xe19   : > { %v1270_v49 = vadd.f32 %v1585_v47, %v1263_v48 }
 0xe1b   : > { %v1271_v31 = vpack.c.bf16 %v1270_v49, %v1270_v49 }
 0xe1d   : > { %1729 = vmatmul.mubr.msk.bf16.vlgmr.msra.gmra.mxu1 %vm494_vm0, %v1271_v31 }
 0xedd   : > { %v1332_v57 = vpop.f32.mrf.mxu1 }
 0xede   : > { %v1333_v58 = vadd.f32 %v1586_v56, %v1332_v57 }
 0xedf   : > { %v1730_v59 = vpop.f32.mrf.mxu1 }
 0xee0   : > { %v1339_v60 = vmul.f32 0.70710677, %v1333_v58  ;;  %v1338_v1 = vmul.f32 0.5, %v1333_v58 }
 0xee1   : > { %v1335_v61 = vpop.f32.mrf.mxu1 }
 0xee2   : > { %1836 = verf.f32 %v1339_v60 }
 0xee3   : > { %v1731_v62 = vpop.f32.mrf.mxu1 }
 0xeef   : > { %v1837_v63 = vpop.eup %1836 }
 0xef0   : > { %v1341_v2 = vadd.f32 1.0, %v1837_v63 }
 0xef2   : > { %v1342_v8 = vmul.f32 %v1341_v2, %v1338_v1 }
 0xef4   : > { %v1343_v3 = vpack.c.bf16 %v1342_v8, %v1342_v8 }
 0xef6   : > { %1749 = vmatmul.mubr.bf16.vlgmr.msra.gmra.mxu0 %v1343_v3 }
 0xfb6   : > { %v1449_v5 = vpop.f32.mrf.mxu0 }
 0xfb7   : > { %v1450_v6 = vadd.f32 %v1590_v4, %v1449_v5 }
 0xfb8   : > { %v1750_v24 = vpop.f32.mrf.mxu0 }
 0xfb9   : > { %v1455_v7 = vadd.f32 %v1450_v6, %v2187_v29 }
 0xfba   : > { %v1452_v9 = vpop.f32.mrf.mxu0 }
 0xfbb   : > { %v1458_v10 = vsel %vm494_vm0, %v1455_v7, 0.0 }
 0xfbc   : > { %1459 = vadd.xlane.f32.xlu0 %v1458_v10  ;;  %v1751_v11 = vpop.f32.mrf.mxu0 }
0x1045   : > { %v1460_v12 = vpop.xlane.xlu0 %1459 }
0x1046   : > { %v1461_v13 = vmul.f32 0.03125, %v1460_v12 }
0x1048   : > { %v1462_v14 = vsub.f32 %v1455_v7, %v1461_v13 }
0x104a   : > { %v1463_v15 = vmul.f32 %v1462_v14, %v1462_v14 }
0x104c   : > { %v1464_v16 = vsel %vm494_vm0, %v1463_v15, 0.0 }
0x104d   : > { %1465 = vadd.xlane.f32.xlu0 %v1464_v16 }
0x10d6   : > { %v1466_v17 = vpop.xlane.xlu0 %1465 }
0x10d7   : > { %v1467_v18 = vmul.f32 0.03125, %v1466_v17 }
0x10d9   : > { %v1468_v19 = vadd.f32 1e-05, %v1467_v18 }
0x10db   : > { %1838 = vrsqrt.f32 %v1468_v19 }
0x10e8   : > { %v1839_v20 = vpop.eup %1838 }
0x10e9   : > { %v1470_v22 = vmul.f32 %v1839_v20, %v1462_v14 }
0x10eb   : > { %v1477_v25 = vmul.f32 %v1599_v21, %v1470_v22 }
0x10ed   : > { %v1484_v26 = vadd.f32 %v1600_v23, %v1477_v25 }
0x10ef   : > { %1485 = vst.msk [vmem:[%s485_s23] sm:$0xff] %vm494_vm0, %v1484_v26 }
0x10f0   : > { %1853 = shalt.err (!%p1850_p3)
}
0x10f1   : > { %s1854_s3 = scalar_lea.hbm %s1498_s5, 128  ;;  %s1858_s1 = scalar_lea.hbm %s2303_s15, 256 }
0x10f2   : > { %p1855_p4 = scmp.ne.s32.totalorder %s1498_s5, %s1854_s3  ;;  %p1859_p9 = scmp.lt.s32.totalorder %s1498_s5, %s2303_s15 }
0x10f3   : > { %p1860_p10 = scmp.lt.s32.totalorder %s1858_s1, %s1854_s3 }
0x10f4   : > { %p1856_p7 = pnand %p1855_p4, %p2034_p5 }
0x10f5   : > { %p1861_p11 = por %p1860_p10, %p1859_p9 }
0x10f6   : > { %p1857_p8 = pneg %p1856_p7 }
0x10f8   : > { %p1862_p12 = pnand %p1861_p11, %p1857_p8 }
0x10fa   : > { %1865 = shalt.err (!%p1862_p12)
}
0x10fb   : > { %1752 = dma.vmem_to_hbm [thread:$0]  (%p2034_p5), %s1501_s2, 128, %s1498_s5, %s1487_s6  }
0x10fc PF: > { %p1758_p13 = scmp.ge.s32.totalorder %s1900_s21, 2  ;;  %s1512_s23 = sand.u32 1, %s1888_s18  }
0x10fd   : > { %s1513_s25 = scalar_lea.sflag [#allocation3], %s1512_s23 }
0x10fe   : > { %p1755_p0 = pnand %p1758_p13, %p2038_p6 }
0x1100   : > { %p1756_p1 = pneg %p1755_p0 }
0x1102   : > { %1883 = dma.done.wait (%p1756_p1), %s1513_s25, 128  }
0x1103   : > { %1885 = vsyncadd (%p1756_p1), %s1513_s25, 4294967168  ;;  %p25_p2 = scmp.ge.s32.totalorder %s2021_s24, 4   ;;  %s2320_s18 = smov %s1892_s19 }
0x1104   : > { %s2321_s19 = smov %s1896_s20  ;;  %s2322_s20 = smov %s2032_s27 }
0x1105   : > { %s2323_s21 = smov %s2021_s24  ;;  %27 = sbr.rel (!%p25_p2) target bundleno = 11 (0xb), region = 115 }
0x110a   :  { %1518 = vsyncpa [#allocation3], 1 }
0x110b   :  { %1520 = vsyncpa [#allocation3 + $0x1], 1 }

</bundles_post_ra>
